<compile_context>
chip_gen: v6e
topology: v6e:2x2x1
jax: 0.10.0
libtpu: 0.0.40
codegen_flags: <defaults>
</compile_context>

<pallas_src>
import functools

import jax
import jax.numpy as jnp
from jax import lax
from jax.experimental import pallas as pl
from jax.experimental.pallas import tpu as pltpu


def _round_up(x, m):
    return ((x + m - 1) // m) * m


def _mlpa_kernel(x_ref, w1_ref, b1_ref, w2_ref, b2_ref, w3_ref, b3_ref, o_ref,
                 *, sub_p, n_sub):
    """One row-tile of the fused 3-layer MLP on the packed (rows//P, P*D) layout.

    Sub-tiles `sub_p` packed rows at a time so h1/h2 stay register-resident.
    """

    def body(j, carry):
        r0 = pl.multiple_of(j * sub_p, 8)
        x = x_ref[pl.ds(r0, sub_p), :].astype(jnp.float32)
        h1 = jnp.tanh(
            jnp.dot(x, w1_ref[...], preferred_element_type=jnp.float32)
            + b1_ref[...]
        )
        h2 = jnp.tanh(
            jnp.dot(h1, w2_ref[...], preferred_element_type=jnp.float32)
            + b2_ref[...]
        )
        out = (
            jnp.dot(h2, w3_ref[...], preferred_element_type=jnp.float32)
            + b3_ref[...]
        )
        o_ref[pl.ds(r0, sub_p), :] = out.astype(o_ref.dtype)
        return carry

    lax.fori_loop(0, n_sub, body, 0, unroll=True)


@functools.partial(jax.jit, static_argnames=("tile_m",))
def mlpa_forward(x, params, tile_m=512):
    """x: (..., D) with leading dims = (bs, ws, ps) or (ws, ps)."""
    w1, b1, w2, b2, w3, b3 = params
    D = w1.shape[0]
    orig_shape = x.shape
    assert x.ndim in (3, 4), "Input tensor dim must be 3 or 4"
    assert orig_shape[-1] == D

    # Row-pack factor: put P consecutive rows side-by-side on the 128-lane axis.
    P = 128 // D if (D < 128 and 128 % D == 0) else 1
    PD = P * D
    row_align = 8 * P

    x2 = x.reshape(-1, D)
    n = x2.shape[0]
    n8 = _round_up(max(n, row_align), row_align)

    # Row-tile size: big tiles amortize per-grid-step overhead; keep >= 2 grid
    # steps for mid-size inputs so v7x's two TensorCores both get work.
    tile_m = max(row_align, _round_up(tile_m, row_align))
    if n8 > tile_m:
        tm = tile_m
    elif n8 >= 512:
        tm = _round_up((n8 + 1) // 2, row_align)
    else:
        tm = n8
    n_pad = _round_up(n8, tm)

    if n_pad != n:
        x2 = jnp.pad(x2, ((0, n_pad - n), (0, 0)))

    # Lane-dense packed layout: (n_pad, D) -> (n_pad//P, P*D).  Weights become
    # block-diagonal (kron(I_P, W)) and biases tiled; the packed matmuls are
    # exactly equivalent to the unpacked ones (the extra entries are zeros).
    xp = x2.reshape(n_pad // P, PD)
    eye = jnp.eye(P, dtype=w1.dtype)
    w1p = jnp.kron(eye, w1)            # (P*D,  P*4D)
    w2p = jnp.kron(eye, w2)            # (P*4D, P*2D)
    w3p = jnp.kron(eye, w3)            # (P*2D, P*D)
    b1p = jnp.tile(b1, (1, P))
    b2p = jnp.tile(b2, (1, P))
    b3p = jnp.tile(b3, (1, P))

    # Sub-tile size (packed rows) inside the kernel: bound live intermediates.
    tm_p = tm // P
    if tm_p % 32 == 0:
        sub_p = 32
    elif tm_p % 16 == 0:
        sub_p = 16
    else:
        sub_p = 8  # tm_p is always a multiple of 8
    n_sub = tm_p // sub_p

    grid = (n_pad // tm,)
    kernel = functools.partial(_mlpa_kernel, sub_p=sub_p, n_sub=n_sub)

    weight_elems = (w1p.size + w2p.size + w3p.size
                    + b1p.size + b2p.size + b3p.size)
    cost = pl.CostEstimate(
        flops=2 * n_pad * 14 * D * D,
        transcendentals=n_pad * 6 * D,
        bytes_accessed=4 * (2 * n_pad * D + weight_elems),
    )

    out_p = pl.pallas_call(
        kernel,
        out_shape=jax.ShapeDtypeStruct((n_pad // P, PD), x.dtype),
        grid_spec=pltpu.PrefetchScalarGridSpec(
            num_scalar_prefetch=0,
            grid=grid,
            in_specs=[
                pl.BlockSpec((tm_p, PD), lambda i: (i, 0)),    # packed x tile
                pl.BlockSpec(w1p.shape, lambda i: (0, 0)),     # grid-invariant
                pl.BlockSpec(b1p.shape, lambda i: (0, 0)),
                pl.BlockSpec(w2p.shape, lambda i: (0, 0)),
                pl.BlockSpec(b2p.shape, lambda i: (0, 0)),
                pl.BlockSpec(w3p.shape, lambda i: (0, 0)),
                pl.BlockSpec(b3p.shape, lambda i: (0, 0)),
            ],
            out_specs=pl.BlockSpec((tm_p, PD), lambda i: (i, 0)),
        ),
        compiler_params=pltpu.CompilerParams(
            dimension_semantics=("parallel",),
        ),
        cost_estimate=cost,
    )(xp, w1p, b1p, w2p, b2p, w3p, b3p)

    out = out_p.reshape(n_pad, D)[:n]
    return out.reshape(orig_shape)


def init_params(key, dims, dtype=jnp.float32):
    """nn.Linear-style init (uniform +-1/sqrt(fan_in)); W stored as (in, out)."""

    def linear(k, fan_in, fan_out):
        kw, kb = jax.random.split(k)
        bound = 1.0 / (fan_in ** 0.5)
        w = jax.random.uniform(kw, (fan_in, fan_out), dtype, -bound, bound)
        b = jax.random.uniform(kb, (1, fan_out), dtype, -bound, bound)
        return w, b

    k1, k2, k3 = jax.random.split(key, 3)
    w1, b1 = linear(k1, dims, dims * 4)
    w2, b2 = linear(k2, dims * 4, dims * 2)
    w3, b3 = linear(k3, dims * 2, dims)
    return (w1, b1, w2, b2, w3, b3)


def _reference(x, params):
    w1, b1, w2, b2, w3, b3 = params
    shp = x.shape
    x2 = x.reshape(-1, shp[-1]).astype(jnp.float32)
    h1 = jnp.tanh(x2 @ w1 + b1)
    h2 = jnp.tanh(h1 @ w2 + b2)
    return ((h2 @ w3 + b3).astype(x.dtype)).reshape(shp)


if __name__ == "__main__":
    key = jax.random.PRNGKey(0)
    k_x, k_p = jax.random.split(key)

    dims = 32
    params = init_params(k_p, dims)

    # 4-D branch (bs, ws, ps, d) — small spec-consistent shape.
    bs, ws, ps = 2, 4, 8
    x4 = jax.random.normal(k_x, (bs, ws, ps, dims), dtype=jnp.float32)
    out4 = jax.block_until_ready(mlpa_forward(x4, params))
    assert out4.shape == x4.shape
    assert jnp.allclose(out4, _reference(x4, params), atol=1e-4, rtol=1e-4)

    # 3-D branch (ws, ps, d).
    x3 = jax.random.normal(k_x, (4, 8, dims), dtype=jnp.float32)
    out3 = jax.block_until_ready(mlpa_forward(x3, params))
    assert out3.shape == x3.shape
    assert jnp.allclose(out3, _reference(x3, params), atol=1e-4, rtol=1e-4)

    # Larger 4-D case: exercises multi-step grid, row padding and sub-tiling.
    xl = jax.random.normal(k_x, (3, 25, 17, dims), dtype=jnp.float32)
    outl = jax.block_until_ready(mlpa_forward(xl, params))
    assert outl.shape == xl.shape
    assert jnp.allclose(outl, _reference(xl, params), atol=1e-4, rtol=1e-4)

    print("KERNEL_OK")
</pallas_src>

<mosaic_0001>
module attributes {stable_mosaic.version = 11 : i64} {
  func.func @_mlpa_kernel(%arg0: i32, %arg1: memref<16x128xf32, #tpu.memory_space<vmem>>, %arg2: memref<128x512xf32, #tpu.memory_space<vmem>>, %arg3: memref<1x512xf32, #tpu.memory_space<vmem>>, %arg4: memref<512x256xf32, #tpu.memory_space<vmem>>, %arg5: memref<1x256xf32, #tpu.memory_space<vmem>>, %arg6: memref<256x128xf32, #tpu.memory_space<vmem>>, %arg7: memref<1x128xf32, #tpu.memory_space<vmem>>, %arg8: memref<16x128xf32, #tpu.memory_space<vmem>>) attributes {dimension_semantics = [#tpu.dimension_semantics<parallel>], iteration_bounds = array<i64: 1>, scalar_prefetch = 0 : i64, scratch_operands = 0 : i64, tpu.core_type = #tpu.core_type<tc>, window_params = [{transform_indices = @transform_0, window_bounds = array<i64: 16, 128>}, {pipeline_mode = #tpu.pipeline_mode<synchronous>, transform_indices = @transform_1, window_bounds = array<i64: 128, 512>}, {pipeline_mode = #tpu.pipeline_mode<synchronous>, transform_indices = @transform_2, window_bounds = array<i64: 1, 512>}, {pipeline_mode = #tpu.pipeline_mode<synchronous>, transform_indices = @transform_3, window_bounds = array<i64: 512, 256>}, {pipeline_mode = #tpu.pipeline_mode<synchronous>, transform_indices = @transform_4, window_bounds = array<i64: 1, 256>}, {pipeline_mode = #tpu.pipeline_mode<synchronous>, transform_indices = @transform_5, window_bounds = array<i64: 256, 128>}, {pipeline_mode = #tpu.pipeline_mode<synchronous>, transform_indices = @transform_6, window_bounds = array<i64: 1, 128>}, {transform_indices = @transform_7, window_bounds = array<i64: 16, 128>}]} {
    %c0_i32 = arith.constant 0 : i32
    %c16_i32 = arith.constant 16 : i32
    %0 = arith.muli %c0_i32, %c16_i32 : i32
    %1 = tpu.assume_multiple %0, 8 : i32
    %2 = arith.index_cast %1 : i32 to index
    %c0 = arith.constant 0 : index
    %3 = vector.load %arg1[%2, %c0] : memref<16x128xf32, #tpu.memory_space<vmem>>, vector<16x128xf32>
    %c0_0 = arith.constant 0 : index
    %c0_1 = arith.constant 0 : index
    %4 = vector.load %arg2[%c0_0, %c0_1] : memref<128x512xf32, #tpu.memory_space<vmem>>, vector<128x512xf32>
    %cst = arith.constant dense<0.000000e+00> : vector<16x512xf32>
    %5 = tpu.matmul %3, %4, %cst {dimension_numbers = #tpu.dot_dimension_numbers<[1], [0], [0], [1], [0, 0, 1, 1], [], []>} : vector<16x128xf32>, vector<128x512xf32>, vector<16x512xf32> -> vector<16x512xf32>
    %c0_2 = arith.constant 0 : index
    %c0_3 = arith.constant 0 : index
    %6 = vector.load %arg3[%c0_2, %c0_3] : memref<1x512xf32, #tpu.memory_space<vmem>>, vector<1x512xf32>
    %7 = vector.broadcast %6 : vector<1x512xf32> to vector<16x512xf32>
    %8 = arith.addf %5, %7 : vector<16x512xf32>
    %9 = math.tanh %8 : vector<16x512xf32>
    %c0_4 = arith.constant 0 : index
    %c0_5 = arith.constant 0 : index
    %10 = vector.load %arg4[%c0_4, %c0_5] : memref<512x256xf32, #tpu.memory_space<vmem>>, vector<512x256xf32>
    %cst_6 = arith.constant dense<0.000000e+00> : vector<16x256xf32>
    %11 = tpu.matmul %9, %10, %cst_6 {dimension_numbers = #tpu.dot_dimension_numbers<[1], [0], [0], [1], [0, 0, 1, 1], [], []>} : vector<16x512xf32>, vector<512x256xf32>, vector<16x256xf32> -> vector<16x256xf32>
    %c0_7 = arith.constant 0 : index
    %c0_8 = arith.constant 0 : index
    %12 = vector.load %arg5[%c0_7, %c0_8] : memref<1x256xf32, #tpu.memory_space<vmem>>, vector<1x256xf32>
    %13 = vector.broadcast %12 : vector<1x256xf32> to vector<16x256xf32>
    %14 = arith.addf %11, %13 : vector<16x256xf32>
    %15 = math.tanh %14 : vector<16x256xf32>
    %c0_9 = arith.constant 0 : index
    %c0_10 = arith.constant 0 : index
    %16 = vector.load %arg6[%c0_9, %c0_10] : memref<256x128xf32, #tpu.memory_space<vmem>>, vector<256x128xf32>
    %cst_11 = arith.constant dense<0.000000e+00> : vector<16x128xf32>
    %17 = tpu.matmul %15, %16, %cst_11 {dimension_numbers = #tpu.dot_dimension_numbers<[1], [0], [0], [1], [0, 0, 1, 1], [], []>} : vector<16x256xf32>, vector<256x128xf32>, vector<16x128xf32> -> vector<16x128xf32>
    %c0_12 = arith.constant 0 : index
    %c0_13 = arith.constant 0 : index
    %18 = vector.load %arg7[%c0_12, %c0_13] : memref<1x128xf32, #tpu.memory_space<vmem>>, vector<1x128xf32>
    %19 = vector.broadcast %18 : vector<1x128xf32> to vector<16x128xf32>
    %20 = arith.addf %17, %19 : vector<16x128xf32>
    %21 = arith.index_cast %1 : i32 to index
    %c0_14 = arith.constant 0 : index
    %22 = vector.load %arg8[%21, %c0_14] : memref<16x128xf32, #tpu.memory_space<vmem>>, vector<16x128xf32>
    tpu.vector_store %arg8[%21, %c0_14], %20 {strides = array<i32>} : memref<16x128xf32, #tpu.memory_space<vmem>>, vector<16x128xf32>,
    %c1_i32 = arith.constant 1 : i32
    return
  }
  func.func @transform_0(%arg0: i32) -> (i32, i32) {
    %c0_i32 = arith.constant 0 : i32
    %c0_i32_0 = arith.constant 0 : i32
    return %arg0, %c0_i32 : i32, i32
  }
  func.func @transform_1(%arg0: i32) -> (i32, i32) {
    %c0_i32 = arith.constant 0 : i32
    %c0_i32_0 = arith.constant 0 : i32
    %c0_i32_1 = arith.constant 0 : i32
    return %c0_i32, %c0_i32_0 : i32, i32
  }
  func.func @transform_2(%arg0: i32) -> (i32, i32) {
    %c0_i32 = arith.constant 0 : i32
    %c0_i32_0 = arith.constant 0 : i32
    %c0_i32_1 = arith.constant 0 : i32
    return %c0_i32, %c0_i32_0 : i32, i32
  }
  func.func @transform_3(%arg0: i32) -> (i32, i32) {
    %c0_i32 = arith.constant 0 : i32
    %c0_i32_0 = arith.constant 0 : i32
    %c0_i32_1 = arith.constant 0 : i32
    return %c0_i32, %c0_i32_0 : i32, i32
  }
  func.func @transform_4(%arg0: i32) -> (i32, i32) {
    %c0_i32 = arith.constant 0 : i32
    %c0_i32_0 = arith.constant 0 : i32
    %c0_i32_1 = arith.constant 0 : i32
    return %c0_i32, %c0_i32_0 : i32, i32
  }
  func.func @transform_5(%arg0: i32) -> (i32, i32) {
    %c0_i32 = arith.constant 0 : i32
    %c0_i32_0 = arith.constant 0 : i32
    %c0_i32_1 = arith.constant 0 : i32
    return %c0_i32, %c0_i32_0 : i32, i32
  }
  func.func @transform_6(%arg0: i32) -> (i32, i32) {
    %c0_i32 = arith.constant 0 : i32
    %c0_i32_0 = arith.constant 0 : i32
    %c0_i32_1 = arith.constant 0 : i32
    return %c0_i32, %c0_i32_0 : i32, i32
  }
  func.func @transform_7(%arg0: i32) -> (i32, i32) {
    %c0_i32 = arith.constant 0 : i32
    %c0_i32_0 = arith.constant 0 : i32
    return %arg0, %c0_i32 : i32, i32
  }
}

</mosaic_0001>

<bundles_post_ra>
// kernel: mlpa_forward.1
= control target key start
LH: loop header
LB: loop body
LE: loop exit
PB: predicated region body
PF: predicated region fallthrough
CT: control target
= control target key end

     0   :  { %v790_v3 = vmov 0.0   ;;  %s1542_s1 = inlined_call_operand.vmem [shape: f32[128,512], index: 1, kind: input, shape index: {}]   ;;  %s1543_s0 = inlined_call_operand.vmem [shape: f32[16,128], index: 0, kind: input, shape index: {}]   ;;  %s1544_s3 = inlined_call_operand.vmem [shape: f32[512,256], index: 3, kind: input, shape index: {}]   ;;  %s1545_s5 = inlined_call_operand.vmem [shape: f32[256,128], index: 5, kind: input, shape index: {}]   ;;  %s1546_s2 = inlined_call_operand.vmem [shape: f32[1,512], index: 2, kind: input, shape index: {}]   ;;  %s1547_s4 = inlined_call_operand.vmem [shape: f32[1,256], index: 4, kind: input, shape index: {}]   ;;  %s1548_s6 = inlined_call_operand.vmem [shape: f32[1,128], index: 6, kind: input, shape index: {}]   ;;  %s1549_s7 = inlined_call_operand.vmem [shape: f32[16,128], index: 7, kind: output, shape index: {}]  }
   0x1   :  { %v89_v0 = vld [vmem:[%s1542_s1 + $0x1e8] sm:$0xff]  ;;  %v91_v1 = vld [vmem:[%s1542_s1 + $0x1f8] sm:$0xff]  ;;  %v88_v2 = vld [vmem:[%s1542_s1 + $0x1e0] sm:$0xff]  ;;  %178 = vmatprep.mubr.f32.mxu0 %v790_v3  ;;  %255 = vmatprep.mubr.f32.mxu1 %v790_v3 }
   0x2   :  { %114 = vmatprep.subr.mxu0 %v89_v0  ;;  %191 = vmatprep.subr.mxu1 %v91_v1  ;;  %v90_v4 = vld [vmem:[%s1542_s1 + $0x1f0] sm:$0xff]  ;;  %v85_v5 = vld [vmem:[%s1542_s1 + $0x1c8] sm:$0xff]  ;;  %v87_v6 = vld [vmem:[%s1542_s1 + $0x1d8] sm:$0xff] }
   0x3   :  { %115 = vmatpush1.msra.mxu0 %v88_v2  ;;  %192 = vmatpush1.msra.mxu1 %v90_v4  ;;  %v84_v7 = vld [vmem:[%s1542_s1 + $0x1c0] sm:$0xff]  ;;  %v86_v8 = vld [vmem:[%s1542_s1 + $0x1d0] sm:$0xff]  ;;  %v81_v9 = vld [vmem:[%s1542_s1 + $0x1a8] sm:$0xff] }
   0x4   :  { %116 = vmatprep.subr.mxu0 %v85_v5  ;;  %193 = vmatprep.subr.mxu1 %v87_v6  ;;  %v83_v10 = vld [vmem:[%s1542_s1 + $0x1b8] sm:$0xff]  ;;  %v80_v11 = vld [vmem:[%s1542_s1 + $0x1a0] sm:$0xff]  ;;  %v82_v12 = vld [vmem:[%s1542_s1 + $0x1b0] sm:$0xff] }
   0x5   :  { %117 = vmatpush1.msra.mxu0 %v84_v7  ;;  %194 = vmatpush1.msra.mxu1 %v86_v8  ;;  %v77_v13 = vld [vmem:[%s1542_s1 + $0x188] sm:$0xff]  ;;  %v79_v14 = vld [vmem:[%s1542_s1 + $0x198] sm:$0xff]  ;;  %v76_v15 = vld [vmem:[%s1542_s1 + $0x180] sm:$0xff] }
   0x6   :  { %118 = vmatprep.subr.mxu0 %v81_v9  ;;  %195 = vmatprep.subr.mxu1 %v83_v10  ;;  %v78_v16 = vld [vmem:[%s1542_s1 + $0x190] sm:$0xff]  ;;  %v73_v17 = vld [vmem:[%s1542_s1 + $0x168] sm:$0xff]  ;;  %v75_v18 = vld [vmem:[%s1542_s1 + $0x178] sm:$0xff] }
   0x7   :  { %119 = vmatpush1.msra.mxu0 %v80_v11  ;;  %196 = vmatpush1.msra.mxu1 %v82_v12  ;;  %v72_v19 = vld [vmem:[%s1542_s1 + $0x160] sm:$0xff]  ;;  %v74_v20 = vld [vmem:[%s1542_s1 + $0x170] sm:$0xff]  ;;  %v69_v21 = vld [vmem:[%s1542_s1 + $0x148] sm:$0xff] }
   0x8   :  { %120 = vmatprep.subr.mxu0 %v77_v13  ;;  %197 = vmatprep.subr.mxu1 %v79_v14  ;;  %v71_v22 = vld [vmem:[%s1542_s1 + $0x158] sm:$0xff]  ;;  %v68_v23 = vld [vmem:[%s1542_s1 + $0x140] sm:$0xff]  ;;  %v70_v24 = vld [vmem:[%s1542_s1 + $0x150] sm:$0xff] }
   0x9   :  { %121 = vmatpush1.msra.mxu0 %v76_v15  ;;  %198 = vmatpush1.msra.mxu1 %v78_v16  ;;  %v65_v25 = vld [vmem:[%s1542_s1 + $0x128] sm:$0xff]  ;;  %v67_v26 = vld [vmem:[%s1542_s1 + $0x138] sm:$0xff]  ;;  %v64_v27 = vld [vmem:[%s1542_s1 + $0x120] sm:$0xff] }
   0xa   :  { %122 = vmatprep.subr.mxu0 %v73_v17  ;;  %199 = vmatprep.subr.mxu1 %v75_v18  ;;  %v66_v28 = vld [vmem:[%s1542_s1 + $0x130] sm:$0xff]  ;;  %v61_v29 = vld [vmem:[%s1542_s1 + $0x108] sm:$0xff]  ;;  %v63_v30 = vld [vmem:[%s1542_s1 + $0x118] sm:$0xff] }
   0xb   :  { %123 = vmatpush1.msra.mxu0 %v72_v19  ;;  %200 = vmatpush1.msra.mxu1 %v74_v20  ;;  %v60_v31 = vld [vmem:[%s1542_s1 + $0x100] sm:$0xff]  ;;  %v62_v32 = vld [vmem:[%s1542_s1 + $0x110] sm:$0xff]  ;;  %v57_v33 = vld [vmem:[%s1542_s1 + $0xe8] sm:$0xff] }
   0xc   :  { %124 = vmatprep.subr.mxu0 %v69_v21  ;;  %201 = vmatprep.subr.mxu1 %v71_v22  ;;  %v59_v34 = vld [vmem:[%s1542_s1 + $0xf8] sm:$0xff]  ;;  %v56_v35 = vld [vmem:[%s1542_s1 + $0xe0] sm:$0xff]  ;;  %v58_v36 = vld [vmem:[%s1542_s1 + $0xf0] sm:$0xff] }
   0xd   :  { %125 = vmatpush1.msra.mxu0 %v68_v23  ;;  %202 = vmatpush1.msra.mxu1 %v70_v24  ;;  %v53_v37 = vld [vmem:[%s1542_s1 + $0xc8] sm:$0xff]  ;;  %v55_v38 = vld [vmem:[%s1542_s1 + $0xd8] sm:$0xff]  ;;  %v52_v39 = vld [vmem:[%s1542_s1 + $0xc0] sm:$0xff] }
   0xe   :  { %126 = vmatprep.subr.mxu0 %v65_v25  ;;  %203 = vmatprep.subr.mxu1 %v67_v26  ;;  %v54_v40 = vld [vmem:[%s1542_s1 + $0xd0] sm:$0xff]  ;;  %v49_v41 = vld [vmem:[%s1542_s1 + $0xa8] sm:$0xff]  ;;  %v51_v42 = vld [vmem:[%s1542_s1 + $0xb8] sm:$0xff] }
   0xf   :  { %127 = vmatpush1.msra.mxu0 %v64_v27  ;;  %204 = vmatpush1.msra.mxu1 %v66_v28  ;;  %v48_v43 = vld [vmem:[%s1542_s1 + $0xa0] sm:$0xff]  ;;  %v50_v44 = vld [vmem:[%s1542_s1 + $0xb0] sm:$0xff]  ;;  %v45_v45 = vld [vmem:[%s1542_s1 + $0x88] sm:$0xff] }
  0x10   :  { %128 = vmatprep.subr.mxu0 %v61_v29  ;;  %205 = vmatprep.subr.mxu1 %v63_v30  ;;  %v47_v46 = vld [vmem:[%s1542_s1 + $0x98] sm:$0xff]  ;;  %v44_v47 = vld [vmem:[%s1542_s1 + $0x80] sm:$0xff]  ;;  %v46_v48 = vld [vmem:[%s1542_s1 + $0x90] sm:$0xff] }
  0x11   :  { %129 = vmatpush1.msra.mxu0 %v60_v31  ;;  %206 = vmatpush1.msra.mxu1 %v62_v32  ;;  %v41_v49 = vld [vmem:[%s1542_s1 + $0x68] sm:$0xff]  ;;  %v43_v50 = vld [vmem:[%s1542_s1 + $0x78] sm:$0xff]  ;;  %v40_v51 = vld [vmem:[%s1542_s1 + $0x60] sm:$0xff] }
  0x12   :  { %130 = vmatprep.subr.mxu0 %v57_v33  ;;  %207 = vmatprep.subr.mxu1 %v59_v34  ;;  %v42_v52 = vld [vmem:[%s1542_s1 + $0x70] sm:$0xff]  ;;  %v37_v53 = vld [vmem:[%s1542_s1 + $0x48] sm:$0xff]  ;;  %v39_v54 = vld [vmem:[%s1542_s1 + $0x58] sm:$0xff] }
  0x13   :  { %131 = vmatpush1.msra.mxu0 %v56_v35  ;;  %208 = vmatpush1.msra.mxu1 %v58_v36  ;;  %v36_v55 = vld [vmem:[%s1542_s1 + $0x40] sm:$0xff]  ;;  %v38_v56 = vld [vmem:[%s1542_s1 + $0x50] sm:$0xff]  ;;  %v33_v57 = vld [vmem:[%s1542_s1 + $0x28] sm:$0xff] }
  0x14   :  { %132 = vmatprep.subr.mxu0 %v53_v37  ;;  %209 = vmatprep.subr.mxu1 %v55_v38  ;;  %v35_v58 = vld [vmem:[%s1542_s1 + $0x38] sm:$0xff]  ;;  %v32_v59 = vld [vmem:[%s1542_s1 + $0x20] sm:$0xff]  ;;  %v34_v60 = vld [vmem:[%s1542_s1 + $0x30] sm:$0xff] }
  0x15   :  { %133 = vmatpush1.msra.mxu0 %v52_v39  ;;  %210 = vmatpush1.msra.mxu1 %v54_v40  ;;  %v29_v61 = vld [vmem:[%s1542_s1 + $0x8] sm:$0xff]  ;;  %v31_v62 = vld [vmem:[%s1542_s1 + $0x18] sm:$0xff]  ;;  %v28_v63 = vld [vmem:[%s1542_s1] sm:$0xff] }
  0x16   :  { %134 = vmatprep.subr.mxu0 %v49_v41  ;;  %211 = vmatprep.subr.mxu1 %v51_v42  ;;  %v30_v0 = vld [vmem:[%s1542_s1 + $0x10] sm:$0xff]  ;;  %v26_v1 = vld [vmem:[%s1543_s0] sm:$0xff]  ;;  %v307_v2 = vld [vmem:[%s1544_s3 + $0xf8] sm:$0xff] }
  0x17   :  { %135 = vmatpush1.msra.mxu0 %v48_v43  ;;  %212 = vmatpush1.msra.mxu1 %v50_v44  ;;  %v371_v4 = vld [vmem:[%s1544_s3 + $0x2f8] sm:$0xff]  ;;  %v306_v5 = vld [vmem:[%s1544_s3 + $0xf0] sm:$0xff]  ;;  %v27_v7 = vld [vmem:[%s1543_s0 + $0x8] sm:$0xff] }
  0x18   :  { %136 = vmatprep.subr.mxu0 %v45_v45  ;;  %213 = vmatprep.subr.mxu1 %v47_v46  ;;  %v370_v6 = vld [vmem:[%s1544_s3 + $0x2f0] sm:$0xff]  ;;  %v305_v8 = vld [vmem:[%s1544_s3 + $0xe8] sm:$0xff]  ;;  %v368_v10 = vld [vmem:[%s1544_s3 + $0x2e0] sm:$0xff] }
  0x19   :  { %137 = vmatpush1.msra.mxu0 %v44_v47  ;;  %214 = vmatpush1.msra.mxu1 %v46_v48  ;;  %v369_v9 = vld [vmem:[%s1544_s3 + $0x2e8] sm:$0xff]  ;;  %v303_v11 = vld [vmem:[%s1544_s3 + $0xd8] sm:$0xff]  ;;  %v302_v13 = vld [vmem:[%s1544_s3 + $0xd0] sm:$0xff] }
  0x1a   :  { %138 = vmatprep.subr.mxu0 %v41_v49  ;;  %215 = vmatprep.subr.mxu1 %v43_v50  ;;  %v367_v12 = vld [vmem:[%s1544_s3 + $0x2d8] sm:$0xff]  ;;  %v366_v14 = vld [vmem:[%s1544_s3 + $0x2d0] sm:$0xff]  ;;  %v301_v15 = vld [vmem:[%s1544_s3 + $0xc8] sm:$0xff] }
  0x1b   :  { %139 = vmatpush1.msra.mxu0 %v40_v51  ;;  %216 = vmatpush1.msra.mxu1 %v42_v52  ;;  %v365_v16 = vld [vmem:[%s1544_s3 + $0x2c8] sm:$0xff]  ;;  %v300_v17 = vld [vmem:[%s1544_s3 + $0xc0] sm:$0xff]  ;;  %v299_v19 = vld [vmem:[%s1544_s3 + $0xb8] sm:$0xff] }
  0x1c   :  { %140 = vmatprep.subr.mxu0 %v37_v53  ;;  %217 = vmatprep.subr.mxu1 %v39_v54  ;;  %v364_v18 = vld [vmem:[%s1544_s3 + $0x2c0] sm:$0xff]  ;;  %v363_v20 = vld [vmem:[%s1544_s3 + $0x2b8] sm:$0xff]  ;;  %v298_v21 = vld [vmem:[%s1544_s3 + $0xb0] sm:$0xff] }
  0x1d   :  { %141 = vmatpush1.msra.mxu0 %v36_v55  ;;  %218 = vmatpush1.msra.mxu1 %v38_v56  ;;  %v362_v22 = vld [vmem:[%s1544_s3 + $0x2b0] sm:$0xff]  ;;  %v297_v23 = vld [vmem:[%s1544_s3 + $0xa8] sm:$0xff]  ;;  %v296_v25 = vld [vmem:[%s1544_s3 + $0xa0] sm:$0xff] }
  0x1e   :  { %142 = vmatprep.subr.mxu0 %v33_v57  ;;  %219 = vmatprep.subr.mxu1 %v35_v58  ;;  %v361_v24 = vld [vmem:[%s1544_s3 + $0x2a8] sm:$0xff]  ;;  %v360_v26 = vld [vmem:[%s1544_s3 + $0x2a0] sm:$0xff]  ;;  %v295_v27 = vld [vmem:[%s1544_s3 + $0x98] sm:$0xff] }
  0x1f   :  { %143 = vmatpush1.msra.mxu0 %v32_v59  ;;  %220 = vmatpush1.msra.mxu1 %v34_v60  ;;  %v359_v28 = vld [vmem:[%s1544_s3 + $0x298] sm:$0xff]  ;;  %v294_v29 = vld [vmem:[%s1544_s3 + $0x90] sm:$0xff]  ;;  %v293_v31 = vld [vmem:[%s1544_s3 + $0x88] sm:$0xff] }
  0x20   :  { %144 = vmatprep.subr.mxu0 %v29_v61  ;;  %221 = vmatprep.subr.mxu1 %v31_v62  ;;  %v358_v30 = vld [vmem:[%s1544_s3 + $0x290] sm:$0xff]  ;;  %v357_v32 = vld [vmem:[%s1544_s3 + $0x288] sm:$0xff]  ;;  %v292_v33 = vld [vmem:[%s1544_s3 + $0x80] sm:$0xff] }
  0x21   :  { %145 = vmatpush1.msra.mxu0 %v28_v63  ;;  %222 = vmatpush1.msra.mxu1 %v30_v0  ;;  %v356_v34 = vld [vmem:[%s1544_s3 + $0x280] sm:$0xff]  ;;  %v291_v35 = vld [vmem:[%s1544_s3 + $0x78] sm:$0xff]  ;;  %v290_v37 = vld [vmem:[%s1544_s3 + $0x70] sm:$0xff] }
  0x22   :  { %179 = vmatmul.mubr.f32.vlgmr.msra.gmra.mxu0 %v26_v1  ;;  %256 = vmatmul.mubr.f32.vlgmr.msra.gmra.mxu1 %v26_v1  ;;  %v355_v36 = vld [vmem:[%s1544_s3 + $0x278] sm:$0xff]  ;;  %v354_v38 = vld [vmem:[%s1544_s3 + $0x270] sm:$0xff]  ;;  %v289_v39 = vld [vmem:[%s1544_s3 + $0x68] sm:$0xff] }
  0x23   :  { %184 = vmatprep.mubr.f32.mxu0 %v790_v3  ;;  %261 = vmatprep.mubr.f32.mxu1 %v790_v3  ;;  %v304_v3 = vld [vmem:[%s1544_s3 + $0xe0] sm:$0xff]  ;;  %v353_v40 = vld [vmem:[%s1544_s3 + $0x268] sm:$0xff]  ;;  %v287_v43 = vld [vmem:[%s1544_s3 + $0x58] sm:$0xff] }
  0x24   :  { %416 = vmatprep.subr.mxu0 %v307_v2  ;;  %493 = vmatprep.subr.mxu1 %v371_v4  ;;  %v288_v41 = vld [vmem:[%s1544_s3 + $0x60] sm:$0xff]  ;;  %v351_v44 = vld [vmem:[%s1544_s3 + $0x258] sm:$0xff]  ;;  %v286_v45 = vld [vmem:[%s1544_s3 + $0x50] sm:$0xff] }
  0x25   :  { %417 = vmatpush1.msra.mxu0 %v306_v5  ;;  %494 = vmatpush1.msra.mxu1 %v370_v6  ;;  %v352_v42 = vld [vmem:[%s1544_s3 + $0x260] sm:$0xff]  ;;  %v350_v46 = vld [vmem:[%s1544_s3 + $0x250] sm:$0xff]  ;;  %v285_v47 = vld [vmem:[%s1544_s3 + $0x48] sm:$0xff] }
  0x26   :  { %185 = vmatmul.mubr.f32.gmra.mxu0 %v27_v7  ;;  %262 = vmatmul.mubr.f32.gmra.mxu1 %v27_v7  ;;  %v349_v48 = vld [vmem:[%s1544_s3 + $0x248] sm:$0xff]  ;;  %v284_v49 = vld [vmem:[%s1544_s3 + $0x40] sm:$0xff]  ;;  %v283_v51 = vld [vmem:[%s1544_s3 + $0x38] sm:$0xff] }
  0x27   :  { %418 = vmatprep.subr.mxu0 %v305_v8  ;;  %495 = vmatprep.subr.mxu1 %v369_v9  ;;  %v348_v50 = vld [vmem:[%s1544_s3 + $0x240] sm:$0xff]  ;;  %v347_v52 = vld [vmem:[%s1544_s3 + $0x238] sm:$0xff]  ;;  %v282_v53 = vld [vmem:[%s1544_s3 + $0x30] sm:$0xff] }
  0x28   :  { %419 = vmatpush1.msra.mxu0 %v304_v3  ;;  %496 = vmatpush1.msra.mxu1 %v368_v10  ;;  %v346_v54 = vld [vmem:[%s1544_s3 + $0x230] sm:$0xff]  ;;  %v281_v55 = vld [vmem:[%s1544_s3 + $0x28] sm:$0xff]  ;;  %v280_v57 = vld [vmem:[%s1544_s3 + $0x20] sm:$0xff] }
  0x29   :  { %420 = vmatprep.subr.mxu0 %v303_v11  ;;  %497 = vmatprep.subr.mxu1 %v367_v12  ;;  %v345_v56 = vld [vmem:[%s1544_s3 + $0x228] sm:$0xff]  ;;  %v344_v58 = vld [vmem:[%s1544_s3 + $0x220] sm:$0xff]  ;;  %v279_v59 = vld [vmem:[%s1544_s3 + $0x18] sm:$0xff] }
  0x2a   :  { %421 = vmatpush1.msra.mxu0 %v302_v13  ;;  %498 = vmatpush1.msra.mxu1 %v366_v14  ;;  %v343_v60 = vld [vmem:[%s1544_s3 + $0x218] sm:$0xff]  ;;  %v278_v61 = vld [vmem:[%s1544_s3 + $0x10] sm:$0xff]  ;;  %v277_v63 = vld [vmem:[%s1544_s3 + $0x8] sm:$0xff] }
  0x2b   :  { %422 = vmatprep.subr.mxu0 %v301_v15  ;;  %499 = vmatprep.subr.mxu1 %v365_v16  ;;  %v342_v62 = vld [vmem:[%s1544_s3 + $0x210] sm:$0xff]  ;;  %v341_v0 = vld [vmem:[%s1544_s3 + $0x208] sm:$0xff]  ;;  %v276_v1 = vld [vmem:[%s1544_s3] sm:$0xff] }
  0x2c   :  { %423 = vmatpush1.msra.mxu0 %v300_v17  ;;  %500 = vmatpush1.msra.mxu1 %v364_v18  ;;  %v340_v2 = vld [vmem:[%s1544_s3 + $0x200] sm:$0xff]  ;;  %v339_v4 = vld [vmem:[%s1544_s3 + $0x1f8] sm:$0xff]  ;;  %v338_v6 = vld [vmem:[%s1544_s3 + $0x1f0] sm:$0xff] }
  0x2d   :  { %424 = vmatprep.subr.mxu0 %v299_v19  ;;  %501 = vmatprep.subr.mxu1 %v363_v20  ;;  %v403_v5 = vld [vmem:[%s1544_s3 + $0x3f8] sm:$0xff]  ;;  %v402_v7 = vld [vmem:[%s1544_s3 + $0x3f0] sm:$0xff]  ;;  %v337_v8 = vld [vmem:[%s1544_s3 + $0x1e8] sm:$0xff] }
  0x2e   :  { %425 = vmatpush1.msra.mxu0 %v298_v21  ;;  %502 = vmatpush1.msra.mxu1 %v362_v22  ;;  %v401_v9 = vld [vmem:[%s1544_s3 + $0x3e8] sm:$0xff]  ;;  %v336_v3 = vld [vmem:[%s1544_s3 + $0x1e0] sm:$0xff]  ;;  %v335_v11 = vld [vmem:[%s1544_s3 + $0x1d8] sm:$0xff] }
  0x2f   :  { %426 = vmatprep.subr.mxu0 %v297_v23  ;;  %503 = vmatprep.subr.mxu1 %v361_v24  ;;  %v400_v10 = vld [vmem:[%s1544_s3 + $0x3e0] sm:$0xff]  ;;  %v399_v12 = vld [vmem:[%s1544_s3 + $0x3d8] sm:$0xff]  ;;  %v334_v13 = vld [vmem:[%s1544_s3 + $0x1d0] sm:$0xff] }
  0x30   :  { %427 = vmatpush1.msra.mxu0 %v296_v25  ;;  %504 = vmatpush1.msra.mxu1 %v360_v26  ;;  %v398_v14 = vld [vmem:[%s1544_s3 + $0x3d0] sm:$0xff]  ;;  %v333_v15 = vld [vmem:[%s1544_s3 + $0x1c8] sm:$0xff]  ;;  %v332_v17 = vld [vmem:[%s1544_s3 + $0x1c0] sm:$0xff] }
  0x31   :  { %428 = vmatprep.subr.mxu0 %v295_v27  ;;  %505 = vmatprep.subr.mxu1 %v359_v28  ;;  %v397_v16 = vld [vmem:[%s1544_s3 + $0x3c8] sm:$0xff]  ;;  %v396_v18 = vld [vmem:[%s1544_s3 + $0x3c0] sm:$0xff]  ;;  %v331_v19 = vld [vmem:[%s1544_s3 + $0x1b8] sm:$0xff] }
  0x32   :  { %429 = vmatpush1.msra.mxu0 %v294_v29  ;;  %506 = vmatpush1.msra.mxu1 %v358_v30  ;;  %v395_v20 = vld [vmem:[%s1544_s3 + $0x3b8] sm:$0xff]  ;;  %v330_v21 = vld [vmem:[%s1544_s3 + $0x1b0] sm:$0xff]  ;;  %v329_v23 = vld [vmem:[%s1544_s3 + $0x1a8] sm:$0xff] }
  0x33   :  { %430 = vmatprep.subr.mxu0 %v293_v31  ;;  %507 = vmatprep.subr.mxu1 %v357_v32  ;;  %v394_v22 = vld [vmem:[%s1544_s3 + $0x3b0] sm:$0xff]  ;;  %v393_v24 = vld [vmem:[%s1544_s3 + $0x3a8] sm:$0xff]  ;;  %v328_v25 = vld [vmem:[%s1544_s3 + $0x1a0] sm:$0xff] }
  0x34   :  { %431 = vmatpush1.msra.mxu0 %v292_v33  ;;  %508 = vmatpush1.msra.mxu1 %v356_v34  ;;  %v392_v26 = vld [vmem:[%s1544_s3 + $0x3a0] sm:$0xff]  ;;  %v327_v27 = vld [vmem:[%s1544_s3 + $0x198] sm:$0xff]  ;;  %v326_v29 = vld [vmem:[%s1544_s3 + $0x190] sm:$0xff] }
  0x35   :  { %432 = vmatprep.subr.mxu0 %v291_v35  ;;  %509 = vmatprep.subr.mxu1 %v355_v36  ;;  %v391_v28 = vld [vmem:[%s1544_s3 + $0x398] sm:$0xff]  ;;  %v390_v30 = vld [vmem:[%s1544_s3 + $0x390] sm:$0xff]  ;;  %v325_v31 = vld [vmem:[%s1544_s3 + $0x188] sm:$0xff] }
  0x36   :  { %433 = vmatpush1.msra.mxu0 %v290_v37  ;;  %510 = vmatpush1.msra.mxu1 %v354_v38  ;;  %v389_v32 = vld [vmem:[%s1544_s3 + $0x388] sm:$0xff]  ;;  %v324_v33 = vld [vmem:[%s1544_s3 + $0x180] sm:$0xff]  ;;  %v323_v35 = vld [vmem:[%s1544_s3 + $0x178] sm:$0xff] }
  0x37   :  { %434 = vmatprep.subr.mxu0 %v289_v39  ;;  %511 = vmatprep.subr.mxu1 %v353_v40  ;;  %v388_v34 = vld [vmem:[%s1544_s3 + $0x380] sm:$0xff]  ;;  %v387_v36 = vld [vmem:[%s1544_s3 + $0x378] sm:$0xff]  ;;  %v322_v37 = vld [vmem:[%s1544_s3 + $0x170] sm:$0xff] }
  0x38   :  { %435 = vmatpush1.msra.mxu0 %v288_v41  ;;  %512 = vmatpush1.msra.mxu1 %v352_v42  ;;  %v386_v38 = vld [vmem:[%s1544_s3 + $0x370] sm:$0xff]  ;;  %v321_v39 = vld [vmem:[%s1544_s3 + $0x168] sm:$0xff]  ;;  %v320_v41 = vld [vmem:[%s1544_s3 + $0x160] sm:$0xff] }
  0x39   :  { %436 = vmatprep.subr.mxu0 %v287_v43  ;;  %513 = vmatprep.subr.mxu1 %v351_v44  ;;  %v385_v40 = vld [vmem:[%s1544_s3 + $0x368] sm:$0xff]  ;;  %v384_v42 = vld [vmem:[%s1544_s3 + $0x360] sm:$0xff]  ;;  %v319_v43 = vld [vmem:[%s1544_s3 + $0x158] sm:$0xff] }
  0x3a   :  { %437 = vmatpush1.msra.mxu0 %v286_v45  ;;  %514 = vmatpush1.msra.mxu1 %v350_v46  ;;  %v383_v44 = vld [vmem:[%s1544_s3 + $0x358] sm:$0xff]  ;;  %v318_v45 = vld [vmem:[%s1544_s3 + $0x150] sm:$0xff] }
  0x3b   :  { %438 = vmatprep.subr.mxu0 %v285_v47  ;;  %515 = vmatprep.subr.mxu1 %v349_v48  ;;  %v382_v46 = vld [vmem:[%s1544_s3 + $0x350] sm:$0xff]  ;;  %v317_v47 = vld [vmem:[%s1544_s3 + $0x148] sm:$0xff] }
  0x3c   :  { %439 = vmatpush1.msra.mxu0 %v284_v49  ;;  %516 = vmatpush1.msra.mxu1 %v348_v50  ;;  %v381_v48 = vld [vmem:[%s1544_s3 + $0x348] sm:$0xff]  ;;  %v316_v49 = vld [vmem:[%s1544_s3 + $0x140] sm:$0xff] }
  0x3d   :  { %440 = vmatprep.subr.mxu0 %v283_v51  ;;  %517 = vmatprep.subr.mxu1 %v347_v52  ;;  %v380_v50 = vld [vmem:[%s1544_s3 + $0x340] sm:$0xff]  ;;  %v315_v51 = vld [vmem:[%s1544_s3 + $0x138] sm:$0xff] }
  0x3e   :  { %441 = vmatpush1.msra.mxu0 %v282_v53  ;;  %518 = vmatpush1.msra.mxu1 %v346_v54  ;;  %v379_v52 = vld [vmem:[%s1544_s3 + $0x338] sm:$0xff]  ;;  %v314_v53 = vld [vmem:[%s1544_s3 + $0x130] sm:$0xff] }
  0x3f   :  { %442 = vmatprep.subr.mxu0 %v281_v55  ;;  %519 = vmatprep.subr.mxu1 %v345_v56  ;;  %v378_v54 = vld [vmem:[%s1544_s3 + $0x330] sm:$0xff]  ;;  %v313_v55 = vld [vmem:[%s1544_s3 + $0x128] sm:$0xff] }
  0x40   :  { %443 = vmatpush1.msra.mxu0 %v280_v57  ;;  %520 = vmatpush1.msra.mxu1 %v344_v58  ;;  %v377_v56 = vld [vmem:[%s1544_s3 + $0x328] sm:$0xff]  ;;  %v312_v57 = vld [vmem:[%s1544_s3 + $0x120] sm:$0xff] }
  0x41   :  { %444 = vmatprep.subr.mxu0 %v279_v59  ;;  %521 = vmatprep.subr.mxu1 %v343_v60  ;;  %v376_v58 = vld [vmem:[%s1544_s3 + $0x320] sm:$0xff]  ;;  %v311_v59 = vld [vmem:[%s1544_s3 + $0x118] sm:$0xff] }
  0x42   :  { %445 = vmatpush1.msra.mxu0 %v278_v61  ;;  %522 = vmatpush1.msra.mxu1 %v342_v62  ;;  %v375_v60 = vld [vmem:[%s1544_s3 + $0x318] sm:$0xff]  ;;  %v310_v61 = vld [vmem:[%s1544_s3 + $0x110] sm:$0xff] }
  0x43   :  { %446 = vmatprep.subr.mxu0 %v277_v63  ;;  %523 = vmatprep.subr.mxu1 %v341_v0  ;;  %v374_v62 = vld [vmem:[%s1544_s3 + $0x310] sm:$0xff]  ;;  %v309_v63 = vld [vmem:[%s1544_s3 + $0x108] sm:$0xff] }
  0x44   :  { %447 = vmatpush1.msra.mxu0 %v276_v1  ;;  %524 = vmatpush1.msra.mxu1 %v340_v2  ;;  %v373_v0 = vld [vmem:[%s1544_s3 + $0x308] sm:$0xff]  ;;  %v308_v1 = vld [vmem:[%s1544_s3 + $0x100] sm:$0xff] }
  0x45   :  { %448 = vmatprep.subr.mxu0 %v339_v4  ;;  %525 = vmatprep.subr.mxu1 %v403_v5  ;;  %v372_v2 = vld [vmem:[%s1544_s3 + $0x300] sm:$0xff]  ;;  %v605_v4 = vld [vmem:[%s1545_s5 + $0xf8] sm:$0xff]  ;;  %v94_v5 = vlaneseq }
  0x46   :  { %449 = vmatpush2.msra.mxu0 %v338_v6  ;;  %526 = vmatpush2.msra.mxu1 %v402_v7 }
  0x47   :  { %450 = vmatprep.subr.mxu0 %v337_v8  ;;  %527 = vmatprep.subr.mxu1 %v401_v9  ;;  %v1420_v6 = vshrl.u32 %v94_v5, 7  ;;  %v92_v9 = vld [vmem:[%s1546_s2] sm:$0xf] }
  0x48   :  { %451 = vmatpush2.msra.mxu0 %v336_v3  ;;  %528 = vmatpush2.msra.mxu1 %v400_v10  ;;  %v590_v5 = vld [vmem:[%s1545_s5 + $0x80] sm:$0xff] }
  0x49   :  { %452 = vmatprep.subr.mxu0 %v335_v11  ;;  %529 = vmatprep.subr.mxu1 %v399_v12  ;;  %v96_v7 = vsub.s32 0, %v1420_v6  ;;  %v104_v8 = vsub.s32 2, %v1420_v6  ;;  %v100_v3 = vsub.s32 1, %v1420_v6  ;;  %v108_v10 = vsub.s32 3, %v1420_v6 }
  0x4a   :  { %453 = vmatpush2.msra.mxu0 %v334_v13  ;;  %530 = vmatpush2.msra.mxu1 %v398_v14 }
  0x4b   :  { %454 = vmatprep.subr.mxu0 %v333_v15  ;;  %531 = vmatprep.subr.mxu1 %v397_v16  ;;  %v97_v11 = vrot.slane %v92_v9, %v96_v7  ;;  %v105_v12 = vrot.slane %v92_v9, %v104_v8  ;;  %v101_v13 = vrot.slane %v92_v9, %v100_v3  ;;  %v574_v8 = vld [vmem:[%s1545_s5] sm:$0xff] }
  0x4c   :  { %455 = vmatpush2.msra.mxu0 %v332_v17  ;;  %532 = vmatpush2.msra.mxu1 %v396_v18  ;;  %v109_v14 = vrot.slane %v92_v9, %v108_v10  ;;  %v404_v9 = vld [vmem:[%s1547_s4] sm:$0x3] }
  0x4d   :  { %456 = vmatprep.subr.mxu0 %v331_v19  ;;  %533 = vmatprep.subr.mxu1 %v395_v20  ;;  %v409_v10 = vrot.slane %v404_v9, %v96_v7 }
  0x4e   :  { %457 = vmatpush2.msra.mxu0 %v330_v21  ;;  %534 = vmatpush2.msra.mxu1 %v394_v22 }
  0x4f   :  { %458 = vmatprep.subr.mxu0 %v329_v23  ;;  %535 = vmatprep.subr.mxu1 %v393_v24 }
  0x50   :  { %459 = vmatpush2.msra.mxu0 %v328_v25  ;;  %536 = vmatpush2.msra.mxu1 %v392_v26 }
  0x51   :  { %460 = vmatprep.subr.mxu0 %v327_v27  ;;  %537 = vmatprep.subr.mxu1 %v391_v28 }
  0x52   :  { %461 = vmatpush2.msra.mxu0 %v326_v29  ;;  %538 = vmatpush2.msra.mxu1 %v390_v30 }
  0x53   :  { %462 = vmatprep.subr.mxu0 %v325_v31  ;;  %539 = vmatprep.subr.mxu1 %v389_v32 }
  0x54   :  { %463 = vmatpush2.msra.mxu0 %v324_v33  ;;  %540 = vmatpush2.msra.mxu1 %v388_v34  ;;  %v589_v34 = vld [vmem:[%s1545_s5 + $0x78] sm:$0xff] }
  0x55   :  { %464 = vmatprep.subr.mxu0 %v323_v35  ;;  %541 = vmatprep.subr.mxu1 %v387_v36  ;;  %v604_v36 = vld [vmem:[%s1545_s5 + $0xf0] sm:$0xff] }
  0x56   :  { %465 = vmatpush2.msra.mxu0 %v322_v37  ;;  %542 = vmatpush2.msra.mxu1 %v386_v38  ;;  %v588_v38 = vld [vmem:[%s1545_s5 + $0x70] sm:$0xff] }
  0x57   :  { %466 = vmatprep.subr.mxu0 %v321_v39  ;;  %543 = vmatprep.subr.mxu1 %v385_v40 }
  0x58   :  { %467 = vmatpush2.msra.mxu0 %v320_v41  ;;  %544 = vmatpush2.msra.mxu1 %v384_v42  ;;  %v603_v41 = vld [vmem:[%s1545_s5 + $0xe8] sm:$0xff] }
  0x59   :  { %468 = vmatprep.subr.mxu0 %v319_v43  ;;  %545 = vmatprep.subr.mxu1 %v383_v44  ;;  %v587_v43 = vld [vmem:[%s1545_s5 + $0x68] sm:$0xff]  ;;  %v602_v44 = vld [vmem:[%s1545_s5 + $0xe0] sm:$0xff] }
  0x5a   :  { %469 = vmatpush2.msra.mxu0 %v318_v45  ;;  %546 = vmatpush2.msra.mxu1 %v382_v46  ;;  %v586_v45 = vld [vmem:[%s1545_s5 + $0x60] sm:$0xff]  ;;  %v601_v46 = vld [vmem:[%s1545_s5 + $0xd8] sm:$0xff] }
  0x5b   :  { %470 = vmatprep.subr.mxu0 %v317_v47  ;;  %547 = vmatprep.subr.mxu1 %v381_v48  ;;  %v585_v47 = vld [vmem:[%s1545_s5 + $0x58] sm:$0xff]  ;;  %v600_v48 = vld [vmem:[%s1545_s5 + $0xd0] sm:$0xff] }
  0x5c   :  { %471 = vmatpush2.msra.mxu0 %v316_v49  ;;  %548 = vmatpush2.msra.mxu1 %v380_v50  ;;  %v584_v49 = vld [vmem:[%s1545_s5 + $0x50] sm:$0xff]  ;;  %v599_v50 = vld [vmem:[%s1545_s5 + $0xc8] sm:$0xff] }
  0x5d   :  { %472 = vmatprep.subr.mxu0 %v315_v51  ;;  %549 = vmatprep.subr.mxu1 %v379_v52  ;;  %v583_v51 = vld [vmem:[%s1545_s5 + $0x48] sm:$0xff]  ;;  %v598_v52 = vld [vmem:[%s1545_s5 + $0xc0] sm:$0xff] }
  0x5e   :  { %473 = vmatpush2.msra.mxu0 %v314_v53  ;;  %550 = vmatpush2.msra.mxu1 %v378_v54  ;;  %v582_v53 = vld [vmem:[%s1545_s5 + $0x40] sm:$0xff]  ;;  %v597_v54 = vld [vmem:[%s1545_s5 + $0xb8] sm:$0xff] }
  0x5f   :  { %474 = vmatprep.subr.mxu0 %v313_v55  ;;  %551 = vmatprep.subr.mxu1 %v377_v56  ;;  %v581_v55 = vld [vmem:[%s1545_s5 + $0x38] sm:$0xff]  ;;  %v596_v56 = vld [vmem:[%s1545_s5 + $0xb0] sm:$0xff] }
  0x60   :  { %475 = vmatpush2.msra.mxu0 %v312_v57  ;;  %552 = vmatpush2.msra.mxu1 %v376_v58  ;;  %v580_v57 = vld [vmem:[%s1545_s5 + $0x30] sm:$0xff]  ;;  %v595_v58 = vld [vmem:[%s1545_s5 + $0xa8] sm:$0xff] }
  0x61   :  { %476 = vmatprep.subr.mxu0 %v311_v59  ;;  %553 = vmatprep.subr.mxu1 %v375_v60  ;;  %v579_v59 = vld [vmem:[%s1545_s5 + $0x28] sm:$0xff]  ;;  %v594_v60 = vld [vmem:[%s1545_s5 + $0xa0] sm:$0xff] }
  0x62   :  { %477 = vmatpush2.msra.mxu0 %v310_v61  ;;  %554 = vmatpush2.msra.mxu1 %v374_v62  ;;  %v578_v61 = vld [vmem:[%s1545_s5 + $0x20] sm:$0xff]  ;;  %v593_v62 = vld [vmem:[%s1545_s5 + $0x98] sm:$0xff] }
  0x63   :  { %478 = vmatprep.subr.mxu0 %v309_v63  ;;  %555 = vmatprep.subr.mxu1 %v373_v0  ;;  %v577_v63 = vld [vmem:[%s1545_s5 + $0x18] sm:$0xff]  ;;  %v592_v0 = vld [vmem:[%s1545_s5 + $0x90] sm:$0xff] }
  0x64   :  { %479 = vmatpush2.msra.mxu0 %v308_v1  ;;  %556 = vmatpush2.msra.mxu1 %v372_v2  ;;  %v576_v1 = vld [vmem:[%s1545_s5 + $0x10] sm:$0xff]  ;;  %v591_v2 = vld [vmem:[%s1545_s5 + $0x88] sm:$0xff] }
  0x65   :  { %695 = vmatprep.subr.mxu0 %v605_v4  ;;  %733 = vmatprep.subr.mxu1 %v605_v4  ;;  %v575_v4 = vld [vmem:[%s1545_s5 + $0x8] sm:$0xff] }
  0xe2   :  { %v180_v15 = vpop.f32.mrf.mxu0  ;;  %v257_v16 = vpop.f32.mrf.mxu1 }
  0xe3   :  { %v181_v17 = vadd.f32 %v180_v15, %v97_v11  ;;  %v258_v18 = vadd.f32 %v257_v16, %v105_v12 }
  0xe4   :  { %v182_v19 = vpop.f32.mrf.mxu0  ;;  %v259_v20 = vpop.f32.mrf.mxu1 }
  0xe5   :  { %766 = vtanh.f32 %v181_v17  ;;  %v183_v21 = vadd.f32 %v182_v19, %v101_v13  ;;  %v260_v22 = vadd.f32 %v259_v20, %v109_v14 }
  0xe6   :  { %768 = vtanh.f32 %v258_v18  ;;  %v186_v23 = vpop.f32.mrf.mxu0  ;;  %v263_v24 = vpop.f32.mrf.mxu1 }
  0xe7   :  { %770 = vtanh.f32 %v183_v21  ;;  %v187_v25 = vadd.f32 %v186_v23, %v97_v11  ;;  %v264_v26 = vadd.f32 %v263_v24, %v105_v12  ;;  %v413_v11 = vrot.slane %v404_v9, %v100_v3 }
  0xe8   :  { %772 = vtanh.f32 %v260_v22  ;;  %v188_v27 = vpop.f32.mrf.mxu0  ;;  %v265_v28 = vpop.f32.mrf.mxu1 }
  0xe9   :  { %774 = vtanh.f32 %v187_v25  ;;  %v189_v29 = vadd.f32 %v188_v27, %v101_v13  ;;  %v266_v30 = vadd.f32 %v265_v28, %v109_v14 }
  0xea   :  { %776 = vtanh.f32 %v264_v26 }
  0xeb   :  { %778 = vtanh.f32 %v189_v29 }
  0xec   :  { %780 = vtanh.f32 %v266_v30  ;;  %v694_v30 = vld [vmem:[%s1548_s6] ss:$0 sm:$0xff] }
  0xf2   :  { %v767_v31 = vpop.eup %766 }
  0xf3   :  { %v769_v32 = vpop.eup %768 }
  0xf4   :  { %v771_v33 = vpop.eup %770 }
  0xf5   :  { %v773_v35 = vpop.eup %772  ;;  %480 = vmatprep.mubr.f32.mxu0 %v771_v33 }
  0xf6   :  { %v775_v37 = vpop.eup %774  ;;  %557 = vmatprep.mubr.f32.mxu1 %v773_v35  ;;  %481 = vmatmul.mubr.f32.vlgmr.msra.gmra.mxu0 %v767_v31 }
  0xf7   :  { %v777_v39 = vpop.eup %776  ;;  %558 = vmatmul.mubr.f32.vlgmr.msra.gmra.mxu1 %v769_v32  ;;  %696 = vmatpush3.msra.mxu0 %v589_v34 }
  0xf8   :  { %v779_v40 = vpop.eup %778  ;;  %697 = vmatprep.subr.mxu0 %v604_v36  ;;  %749 = vmatpush3.msra.mxu1 %v589_v34 }
  0xf9   :  { %v781_v42 = vpop.eup %780  ;;  %486 = vmatprep.mubr.f32.mxu0 %v779_v40  ;;  %698 = vmatpush3.msra.mxu0 %v588_v38 }
  0xfa   :  { %563 = vmatprep.mubr.f32.mxu1 %v781_v42  ;;  %487 = vmatmul.mubr.f32.gmra.mxu0 %v775_v37 }
  0xfb   :  { %564 = vmatmul.mubr.f32.gmra.mxu1 %v777_v39  ;;  %699 = vmatprep.subr.mxu0 %v603_v41 }
  0xfc   :  { %700 = vmatpush3.msra.mxu0 %v587_v43  ;;  %734 = vmatprep.subr.mxu1 %v604_v36 }
  0xfd   :  { %701 = vmatprep.subr.mxu0 %v602_v44  ;;  %750 = vmatpush3.msra.mxu1 %v588_v38 }
  0xfe   :  { %702 = vmatpush3.msra.mxu0 %v586_v45  ;;  %735 = vmatprep.subr.mxu1 %v603_v41 }
  0xff   :  { %703 = vmatprep.subr.mxu0 %v601_v46  ;;  %751 = vmatpush3.msra.mxu1 %v587_v43 }
 0x100   :  { %704 = vmatpush3.msra.mxu0 %v585_v47  ;;  %736 = vmatprep.subr.mxu1 %v602_v44 }
 0x101   :  { %752 = vmatpush3.msra.mxu1 %v586_v45  ;;  %705 = vmatprep.subr.mxu0 %v600_v48 }
 0x102   :  { %737 = vmatprep.subr.mxu1 %v601_v46  ;;  %706 = vmatpush3.msra.mxu0 %v584_v49 }
 0x103   :  { %753 = vmatpush3.msra.mxu1 %v585_v47  ;;  %707 = vmatprep.subr.mxu0 %v599_v50 }
 0x104   :  { %738 = vmatprep.subr.mxu1 %v600_v48  ;;  %708 = vmatpush3.msra.mxu0 %v583_v51 }
 0x105   :  { %754 = vmatpush3.msra.mxu1 %v584_v49  ;;  %709 = vmatprep.subr.mxu0 %v598_v52 }
 0x106   :  { %739 = vmatprep.subr.mxu1 %v599_v50  ;;  %710 = vmatpush3.msra.mxu0 %v582_v53 }
 0x107   :  { %755 = vmatpush3.msra.mxu1 %v583_v51  ;;  %711 = vmatprep.subr.mxu0 %v597_v54 }
 0x108   :  { %740 = vmatprep.subr.mxu1 %v598_v52  ;;  %712 = vmatpush3.msra.mxu0 %v581_v55 }
 0x109   :  { %756 = vmatpush3.msra.mxu1 %v582_v53  ;;  %713 = vmatprep.subr.mxu0 %v596_v56 }
 0x10a   :  { %741 = vmatprep.subr.mxu1 %v597_v54  ;;  %714 = vmatpush3.msra.mxu0 %v580_v57 }
 0x10b   :  { %757 = vmatpush3.msra.mxu1 %v581_v55  ;;  %715 = vmatprep.subr.mxu0 %v595_v58 }
 0x10c   :  { %742 = vmatprep.subr.mxu1 %v596_v56  ;;  %716 = vmatpush3.msra.mxu0 %v579_v59 }
 0x10d   :  { %758 = vmatpush3.msra.mxu1 %v580_v57  ;;  %717 = vmatprep.subr.mxu0 %v594_v60 }
 0x10e   :  { %743 = vmatprep.subr.mxu1 %v595_v58  ;;  %718 = vmatpush3.msra.mxu0 %v578_v61 }
 0x10f   :  { %759 = vmatpush3.msra.mxu1 %v579_v59  ;;  %719 = vmatprep.subr.mxu0 %v593_v62 }
 0x110   :  { %744 = vmatprep.subr.mxu1 %v594_v60  ;;  %720 = vmatpush3.msra.mxu0 %v577_v63 }
 0x111   :  { %760 = vmatpush3.msra.mxu1 %v578_v61  ;;  %721 = vmatprep.subr.mxu0 %v592_v0 }
 0x112   :  { %745 = vmatprep.subr.mxu1 %v593_v62  ;;  %722 = vmatpush3.msra.mxu0 %v576_v1 }
 0x113   :  { %761 = vmatpush3.msra.mxu1 %v577_v63  ;;  %723 = vmatprep.subr.mxu0 %v591_v2 }
 0x114   :  { %746 = vmatprep.subr.mxu1 %v592_v0  ;;  %724 = vmatpush3.msra.mxu0 %v575_v4 }
 0x115   :  { %762 = vmatpush3.msra.mxu1 %v576_v1  ;;  %725 = vmatprep.subr.mxu0 %v590_v5 }
 0x116   :  { %747 = vmatprep.subr.mxu1 %v591_v2  ;;  %726 = vmatpush3.msra.mxu0 %v574_v8 }
 0x117   :  { %763 = vmatpush3.msra.mxu1 %v575_v4 }
 0x118   :  { %748 = vmatprep.subr.mxu1 %v590_v5 }
 0x119   :  { %764 = vmatpush3.msra.mxu1 %v574_v8 }
 0x1b6   :  { %v482_v12 = vpop.f32.mrf.mxu0 }
 0x1b7   :  { %v483_v13 = vadd.f32 %v482_v12, %v409_v10  ;;  %v559_v14 = vpop.f32.mrf.mxu1 }
 0x1b8   :  { %v484_v15 = vpop.f32.mrf.mxu0 }
 0x1b9   :  { %v485_v16 = vadd.f32 %v484_v15, %v413_v11  ;;  %v561_v17 = vpop.f32.mrf.mxu1  ;;  %v560_v18 = vadd.f32 %v559_v14, %v483_v13 }
 0x1ba   :  { %v488_v19 = vpop.f32.mrf.mxu0 }
 0x1bb   :  { %v562_v20 = vadd.f32 %v561_v17, %v485_v16  ;;  %v489_v21 = vadd.f32 %v488_v19, %v409_v10  ;;  %v565_v22 = vpop.f32.mrf.mxu1 }
 0x1bc   :  { %v490_v23 = vpop.f32.mrf.mxu0 }
 0x1bd   :  { %782 = vtanh.f32 %v562_v20  ;;  %v491_v24 = vadd.f32 %v490_v23, %v413_v11  ;;  %v566_v25 = vadd.f32 %v565_v22, %v489_v21  ;;  %v567_v7 = vpop.f32.mrf.mxu1 }
 0x1be   :  { %784 = vtanh.f32 %v560_v18 }
 0x1bf   :  { %v568_v26 = vadd.f32 %v567_v7, %v491_v24 }
 0x1c1   :  { %786 = vtanh.f32 %v568_v26 }
 0x1c2   :  { %788 = vtanh.f32 %v566_v25 }
 0x1ca   :  { %v783_v6 = vpop.eup %782 }
 0x1cb   :  { %v785_v3 = vpop.eup %784  ;;  %677 = vmatprep.mubr.f32.mxu0 %v783_v6 }
 0x1cc   :  { %678 = vmatmul.mubr.f32.vlgmr.msra.gmra.mxu0 %v785_v3 }
 0x1ce   :  { %v787_v27 = vpop.eup %786 }
 0x1cf   :  { %v789_v28 = vpop.eup %788  ;;  %682 = vmatprep.mubr.f32.mxu1 %v787_v27 }
 0x1d0   :  { %683 = vmatmul.mubr.f32.vlgmr.msra.gmra.mxu1 %v789_v28 }
 0x28c   :  { %v727_v29 = vpop.f32.mrf.mxu0 }
 0x28e   :  { %v728_v31 = vpop.f32.mrf.mxu0 }
 0x28f   :  { %v729_v32 = vadd.f32 %v728_v31, %v727_v29 }
 0x290   :  { %v730_v33 = vpop.f32.mrf.mxu1 }
 0x291   :  { %v680_v34 = vadd.f32 %v729_v32, %v694_v30 }
 0x292   :  { %v731_v35 = vpop.f32.mrf.mxu1 }
 0x293   :  { %688 = vst [vmem:[%s1549_s7] sm:$0xff] %v680_v34  ;;  %v732_v36 = vadd.f32 %v731_v35, %v730_v33 }
 0x295   :  { %v685_v37 = vadd.f32 %v732_v36, %v694_v30 }
 0x297   :  { %689 = vst [vmem:[%s1549_s7 + $0x8] sm:$0xff] %v685_v37 }

</bundles_post_ra>
